<compile_context>
chip_gen: v7x
topology: tpu7x:2x2x1
jax: 0.10.0
libtpu: 0.0.40
codegen_flags: <defaults>
</compile_context>

<pallas_src>
import jax
import jax.numpy as jnp
from jax.experimental import pallas as pl
from jax.experimental.pallas import tpu as pltpu

EPS = 1e-12

_HAS_BUFFERED = hasattr(pl, "Buffered")


def _round_up(x, m):
    return (x + m - 1) // m * m


def _cdiv(a, b):
    return (a + b - 1) // b


def _matmul_precision(dtype):
    # f32 inputs: match torch f32 Linear accuracy; bf16: native MXU path.
    return jax.lax.Precision.HIGHEST if dtype == jnp.float32 else None


def _vmem_capacity_bytes():
    try:
        cap = getattr(pltpu.get_tpu_info(), "vmem_capacity_bytes", None)
        if cap:
            return int(cap)
    except Exception:
        pass
    return 128 << 20


def _const_spec(shape, index_map, single_buffer):
    # Constant operand: index_map never changes, so 1 buffer is enough.
    if single_buffer and _HAS_BUFFERED:
        try:
            return pl.BlockSpec(shape, index_map, pipeline_mode=pl.Buffered(1))
        except TypeError:
            pass
    return pl.BlockSpec(shape, index_map)


def _bias_residual_layernorm(acc_f32, res_ref, p_ref, o_ref):
    """acc_f32: (tm, H) f32 dense output; p_ref: (3, H) = [bias; gamma; beta]."""
    p = p_ref[...].astype(jnp.float32)
    h = acc_f32 + p[0:1, :] + res_ref[...].astype(jnp.float32)
    # Dropout: identity (eval mode).
    u = jnp.mean(h, axis=-1, keepdims=True)
    d = h - u
    s = jnp.mean(d * d, axis=-1, keepdims=True)
    # Fold gamma into the rsqrt factor: one broadcast multiply on d.
    scale = p[1:2, :] * jax.lax.rsqrt(s + EPS)
    o_ref[...] = (d * scale + p[2:3, :]).astype(o_ref.dtype)


def _self_output_kernel(x_ref, res_ref, wt_ref, p_ref, o_ref):
    # x_ref: (tm, H); wt_ref: (H_in, H_out) pre-transposed -> x @ w.T in torch terms.
    acc = jnp.dot(
        x_ref[...],
        wt_ref[...],
        preferred_element_type=jnp.float32,
        precision=_matmul_precision(x_ref.dtype),
    )
    _bias_residual_layernorm(acc, res_ref, p_ref, o_ref)


def _self_output_ktiled_kernel(x_ref, res_ref, wt_ref, p_ref, o_ref, acc_ref):
    # Grid: (row_tiles, K_tiles).  acc_ref: (tm, H) f32 scratch accumulator.
    k = pl.program_id(1)

    @pl.when(k == 0)
    def _():
        acc_ref[...] = jnp.zeros_like(acc_ref)

    acc_ref[...] += jnp.dot(
        x_ref[...],
        wt_ref[...],
        preferred_element_type=jnp.float32,
        precision=_matmul_precision(x_ref.dtype),
    )

    @pl.when(k == pl.num_programs(1) - 1)
    def _():
        _bias_residual_layernorm(acc_ref[...], res_ref, p_ref, o_ref)


def self_output(hidden_states, input_tensor, w, b, gamma, beta, *, tm=512, k_tile=None):
    """Fused dense + residual add + LayerNorm (eval-mode dropout).

    hidden_states, input_tensor: (B, S, H).  w: (H_out, H_in) torch nn.Linear
    layout.  b, gamma, beta: (H,).  Returns (B, S, H) in hidden_states.dtype.
    """
    B, S, H = hidden_states.shape
    M = B * S
    act_dtype = hidden_states.dtype
    itemsize = jnp.dtype(act_dtype).itemsize
    w_itemsize = jnp.dtype(w.dtype).itemsize

    # Sublane granularity by activation dtype (f32: 8, bf16/f16: 16, 8-bit: 32).
    sub = 8 if itemsize >= 4 else (16 if itemsize == 2 else 32)

    # Row tile: big by default, clamped to M; ensure >= 2 grid steps when M
    # allows so a 2-TensorCore chip (v7x) can split the "parallel" axis.
    tm_eff = max(sub, min(_round_up(tm, sub), _round_up(M, sub)))
    if _cdiv(M, tm_eff) < 2 and M > sub:
        tm_eff = max(sub, _round_up(_cdiv(M, 2), sub))
    n_row_tiles = _cdiv(M, tm_eff)

    vmem_cap = _vmem_capacity_bytes()
    w_bytes = H * H * w_itemsize

    # K-tiling decision: resident HxH weight too large for the VMEM budget.
    if k_tile is None:
        use_ktiled = (w_bytes > vmem_cap // 3) and (H % 128 == 0)
        tk = 0
        if use_ktiled:
            for cand in (1024, 512, 256, 128):
                if H % cand == 0:
                    tk = cand
                    break
            use_ktiled = tk > 0
    else:
        assert H % k_tile == 0 and k_tile % 128 == 0, "k_tile must divide H and be a multiple of 128"
        tk = k_tile
        use_ktiled = tk < H

    # No activation padding: views only, Pallas handles the ragged last tile.
    x2 = hidden_states.reshape(M, H)
    r2 = input_tensor.reshape(M, H)
    w_t = jnp.transpose(w)                         # (H_in, H_out): K on sublanes
    params = jnp.stack([b, gamma, beta], axis=0)   # (3, H) packed epilogue params

    def build(single_buffer):
        if not use_ktiled:
            grid = (n_row_tiles,)
            in_specs = [
                pl.BlockSpec((tm_eff, H), lambda i: (i, 0)),       # hidden_states tile
                pl.BlockSpec((tm_eff, H), lambda i: (i, 0)),       # residual tile
                _const_spec((H, H), lambda i: (0, 0), single_buffer),  # weight (resident)
                _const_spec((3, H), lambda i: (0, 0), single_buffer),  # bias/gamma/beta
            ]
            out_specs = pl.BlockSpec((tm_eff, H), lambda i: (i, 0))
            scratch_shapes = []
            dim_sem = ("parallel",)
            kernel = _self_output_kernel
            w_buf = 1 if (single_buffer and _HAS_BUFFERED) else 2
            est = (2 * tm_eff * H * itemsize        # x tiles (double-buffered)
                   + 2 * tm_eff * H * itemsize      # residual tiles
                   + 2 * tm_eff * H * itemsize      # output tiles
                   + w_buf * w_bytes                # resident weight
                   + 2 * 3 * H * 4                  # packed params
                   + 4 * tm_eff * H * 4             # f32 epilogue temporaries
                   + (4 << 20))
        else:
            grid = (n_row_tiles, H // tk)
            in_specs = [
                pl.BlockSpec((tm_eff, tk), lambda i, k: (i, k)),   # x K-slice
                pl.BlockSpec((tm_eff, H), lambda i, k: (i, 0)),    # residual tile
                pl.BlockSpec((tk, H), lambda i, k: (k, 0)),        # weight K-slice
                _const_spec((3, H), lambda i, k: (0, 0), single_buffer),
            ]
            out_specs = pl.BlockSpec((tm_eff, H), lambda i, k: (i, 0))
            scratch_shapes = [pltpu.VMEM((tm_eff, H), jnp.float32)]
            dim_sem = ("parallel", "arbitrary")
            kernel = _self_output_ktiled_kernel
            est = (2 * tm_eff * tk * itemsize
                   + 2 * tm_eff * H * itemsize
                   + 2 * tm_eff * H * itemsize
                   + 2 * tk * H * w_itemsize
                   + 2 * 3 * H * 4
                   + tm_eff * H * 4                 # f32 accumulator scratch
                   + 4 * tm_eff * H * 4             # f32 epilogue temporaries
                   + (4 << 20))

        # Generation-aware VMEM budget (128 MiB on v5e/v6e, 64 MiB per TC on v7x).
        vmem_limit = int(min(max(est, 32 << 20), int(vmem_cap * 0.85)))

        return pl.pallas_call(
            kernel,
            out_shape=jax.ShapeDtypeStruct((M, H), act_dtype),
            grid_spec=pltpu.PrefetchScalarGridSpec(
                num_scalar_prefetch=0,
                grid=grid,
                in_specs=in_specs,
                out_specs=out_specs,
                scratch_shapes=scratch_shapes,
            ),
            compiler_params=pltpu.CompilerParams(
                dimension_semantics=dim_sem,
                vmem_limit_bytes=vmem_limit,
            ),
        )

    try:
        out = build(True)(x2, r2, w_t, params)
    except Exception:
        if not _HAS_BUFFERED:
            raise
        # Fallback if this jax/Mosaic version rejects single-buffered constants.
        out = build(False)(x2, r2, w_t, params)

    return out.reshape(B, S, H)


def self_output_ref(hidden_states, input_tensor, w, b, gamma, beta):
    hs = hidden_states.astype(jnp.float32)
    it = input_tensor.astype(jnp.float32)
    wf = w.astype(jnp.float32)
    h = jnp.einsum("bsh,oh->bso", hs, wf, precision=jax.lax.Precision.HIGHEST)
    h = h + b.astype(jnp.float32) + it
    u = jnp.mean(h, axis=-1, keepdims=True)
    s = jnp.mean((h - u) ** 2, axis=-1, keepdims=True)
    x = (h - u) / jnp.sqrt(s + EPS)
    return gamma.astype(jnp.float32) * x + beta.astype(jnp.float32)


if __name__ == "__main__":
    key = jax.random.PRNGKey(0)
    k1, k2, k3, k4, k5, k6, k7, k8 = jax.random.split(key, 8)

    # ---- Case 1: small f32 problem, single-pass (resident-weight) path ----
    B, S, H = 2, 8, 32
    hs = jax.random.normal(k1, (B, S, H), jnp.float32)
    it = jax.random.normal(k2, (B, S, H), jnp.float32)
    bound = 1.0 / float(H) ** 0.5
    w = jax.random.uniform(k3, (H, H), jnp.float32, -bound, bound)   # (out, in)
    b = jax.random.uniform(k4, (H,), jnp.float32, -bound, bound)
    gamma = jnp.ones((H,), jnp.float32)
    beta = jnp.zeros((H,), jnp.float32)

    out = self_output(hs, it, w, b, gamma, beta)
    out = jax.block_until_ready(out)
    ref = self_output_ref(hs, it, w, b, gamma, beta)
    assert out.shape == (B, S, H)
    err = float(jnp.max(jnp.abs(out.astype(jnp.float32) - ref)))
    assert err < 1e-4, f"f32 single-pass mismatch: max abs err {err}"

    # ---- Case 2: bf16, ragged rows, forced K-tiled accumulator path ----
    B2, S2, H2 = 2, 9, 256      # M = 18 -> ragged last row tile
    hs2 = jax.random.normal(k5, (B2, S2, H2), jnp.float32).astype(jnp.bfloat16)
    it2 = jax.random.normal(k6, (B2, S2, H2), jnp.float32).astype(jnp.bfloat16)
    bound2 = 1.0 / float(H2) ** 0.5
    w2 = jax.random.uniform(k7, (H2, H2), jnp.float32, -bound2, bound2).astype(jnp.bfloat16)
    b2 = jax.random.uniform(k8, (H2,), jnp.float32, -bound2, bound2).astype(jnp.bfloat16)
    g2 = jnp.ones((H2,), jnp.bfloat16)
    be2 = jnp.zeros((H2,), jnp.bfloat16)

    out2 = self_output(hs2, it2, w2, b2, g2, be2, k_tile=128)
    out2 = jax.block_until_ready(out2)
    ref2 = self_output_ref(hs2, it2, w2, b2, g2, be2)
    assert out2.shape == (B2, S2, H2)
    err2 = float(jnp.max(jnp.abs(out2.astype(jnp.float32) - ref2)))
    assert err2 < 3e-2, f"bf16 K-tiled mismatch: max abs err {err2}"

    print("KERNEL_OK")
</pallas_src>

<mosaic_0001>
module attributes {stable_mosaic.version = 11 : i64} {
  func.func @_self_output_kernel(%arg0: i32, %arg1: memref<8x32xf32, #tpu.memory_space<vmem>>, %arg2: memref<8x32xf32, #tpu.memory_space<vmem>>, %arg3: memref<32x32xf32, #tpu.memory_space<vmem>>, %arg4: memref<3x32xf32, #tpu.memory_space<vmem>>, %arg5: memref<8x32xf32, #tpu.memory_space<vmem>>) attributes {dimension_semantics = [#tpu.dimension_semantics<parallel>], iteration_bounds = array<i64: 2>, scalar_prefetch = 0 : i64, scratch_operands = 0 : i64, tpu.core_type = #tpu.core_type<tc>, window_params = [{transform_indices = @transform_0, window_bounds = array<i64: 8, 32>}, {transform_indices = @transform_1, window_bounds = array<i64: 8, 32>}, {pipeline_mode = #tpu.pipeline_mode<synchronous>, transform_indices = @transform_2, window_bounds = array<i64: 32, 32>}, {pipeline_mode = #tpu.pipeline_mode<synchronous>, transform_indices = @transform_3, window_bounds = array<i64: 3, 32>}, {transform_indices = @transform_4, window_bounds = array<i64: 8, 32>}]} {
    %c0 = arith.constant 0 : index
    %c0_0 = arith.constant 0 : index
    %0 = vector.load %arg1[%c0, %c0_0] : memref<8x32xf32, #tpu.memory_space<vmem>>, vector<8x32xf32>
    %c0_1 = arith.constant 0 : index
    %c0_2 = arith.constant 0 : index
    %1 = vector.load %arg3[%c0_1, %c0_2] : memref<32x32xf32, #tpu.memory_space<vmem>>, vector<32x32xf32>
    %cst = arith.constant dense<0.000000e+00> : vector<8x32xf32>
    %2 = tpu.matmul %0, %1, %cst {dimension_numbers = #tpu.dot_dimension_numbers<[1], [0], [0], [1], [0, 0, 1, 1], [], []>, precision = #tpu.contract_precision<fp32>} : vector<8x32xf32>, vector<32x32xf32>, vector<8x32xf32> -> vector<8x32xf32>
    %c0_3 = arith.constant 0 : index
    %c0_4 = arith.constant 0 : index
    %3 = vector.load %arg4[%c0_3, %c0_4] : memref<3x32xf32, #tpu.memory_space<vmem>>, vector<3x32xf32>
    %4 = vector.extract_strided_slice %3 {offsets = [0, 0], sizes = [1, 32], strides = [1, 1]} : vector<3x32xf32> to vector<1x32xf32>
    %5 = vector.broadcast %4 : vector<1x32xf32> to vector<8x32xf32>
    %6 = arith.addf %2, %5 : vector<8x32xf32>
    %c0_5 = arith.constant 0 : index
    %c0_6 = arith.constant 0 : index
    %7 = vector.load %arg2[%c0_5, %c0_6] : memref<8x32xf32, #tpu.memory_space<vmem>>, vector<8x32xf32>
    %8 = arith.addf %6, %7 : vector<8x32xf32>
    %cst_7 = arith.constant dense<0.000000e+00> : vector<8xf32>
    %9 = vector.multi_reduction <add>, %8, %cst_7 [1] : vector<8x32xf32> to vector<8xf32>
    %10 = vector.shape_cast %9 : vector<8xf32> to vector<8x1xf32>
    %cst_8 = arith.constant 3.200000e+01 : f32
    %11 = vector.broadcast %cst_8 : f32 to vector<8x1xf32>
    %12 = arith.divf %10, %11 : vector<8x1xf32>
    %13 = vector.broadcast %12 : vector<8x1xf32> to vector<8x32xf32>
    %14 = arith.subf %8, %13 : vector<8x32xf32>
    %15 = arith.mulf %14, %14 : vector<8x32xf32>
    %cst_9 = arith.constant dense<0.000000e+00> : vector<8xf32>
    %16 = vector.multi_reduction <add>, %15, %cst_9 [1] : vector<8x32xf32> to vector<8xf32>
    %17 = vector.shape_cast %16 : vector<8xf32> to vector<8x1xf32>
    %cst_10 = arith.constant 3.200000e+01 : f32
    %18 = vector.broadcast %cst_10 : f32 to vector<8x1xf32>
    %19 = arith.divf %17, %18 : vector<8x1xf32>
    %20 = vector.extract_strided_slice %3 {offsets = [1, 0], sizes = [1, 32], strides = [1, 1]} : vector<3x32xf32> to vector<1x32xf32>
    %cst_11 = arith.constant 9.99999996E-13 : f32
    %21 = vector.broadcast %cst_11 : f32 to vector<8x1xf32>
    %22 = arith.addf %19, %21 : vector<8x1xf32>
    %23 = math.rsqrt %22 : vector<8x1xf32>
    %24 = vector.broadcast %20 : vector<1x32xf32> to vector<8x32xf32>
    %25 = vector.broadcast %23 : vector<8x1xf32> to vector<8x32xf32>
    %26 = arith.mulf %24, %25 : vector<8x32xf32>
    %27 = arith.mulf %14, %26 : vector<8x32xf32>
    %28 = vector.extract_strided_slice %3 {offsets = [2, 0], sizes = [1, 32], strides = [1, 1]} : vector<3x32xf32> to vector<1x32xf32>
    %29 = vector.broadcast %28 : vector<1x32xf32> to vector<8x32xf32>
    %30 = arith.addf %27, %29 : vector<8x32xf32>
    %c0_12 = arith.constant 0 : index
    %c0_13 = arith.constant 0 : index
    %31 = vector.load %arg5[%c0_12, %c0_13] : memref<8x32xf32, #tpu.memory_space<vmem>>, vector<8x32xf32>
    tpu.vector_store %arg5[%c0_12, %c0_13], %30 {strides = array<i32>} : memref<8x32xf32, #tpu.memory_space<vmem>>, vector<8x32xf32>,
    return
  }
  func.func @transform_0(%arg0: i32) -> (i32, i32) {
    %c0_i32 = arith.constant 0 : i32
    %c0_i32_0 = arith.constant 0 : i32
    return %arg0, %c0_i32 : i32, i32
  }
  func.func @transform_1(%arg0: i32) -> (i32, i32) {
    %c0_i32 = arith.constant 0 : i32
    %c0_i32_0 = arith.constant 0 : i32
    return %arg0, %c0_i32 : i32, i32
  }
  func.func @transform_2(%arg0: i32) -> (i32, i32) {
    %c0_i32 = arith.constant 0 : i32
    %c0_i32_0 = arith.constant 0 : i32
    %c0_i32_1 = arith.constant 0 : i32
    return %c0_i32, %c0_i32_0 : i32, i32
  }
  func.func @transform_3(%arg0: i32) -> (i32, i32) {
    %c0_i32 = arith.constant 0 : i32
    %c0_i32_0 = arith.constant 0 : i32
    %c0_i32_1 = arith.constant 0 : i32
    return %c0_i32, %c0_i32_0 : i32, i32
  }
  func.func @transform_4(%arg0: i32) -> (i32, i32) {
    %c0_i32 = arith.constant 0 : i32
    %c0_i32_0 = arith.constant 0 : i32
    return %arg0, %c0_i32 : i32, i32
  }
}

module attributes {stable_mosaic.version = 11 : i64} {
  func.func @_self_output_kernel(%arg0: i32, %arg1: memref<8x32xf32, #tpu.memory_space<vmem>>, %arg2: memref<8x32xf32, #tpu.memory_space<vmem>>, %arg3: memref<32x32xf32, #tpu.memory_space<vmem>>, %arg4: memref<3x32xf32, #tpu.memory_space<vmem>>, %arg5: memref<8x32xf32, #tpu.memory_space<vmem>>) attributes {dimension_semantics = [#tpu.dimension_semantics<parallel>], iteration_bounds = array<i64: 2>, scalar_prefetch = 0 : i64, scratch_operands = 0 : i64, tpu.core_type = #tpu.core_type<tc>, window_params = [{transform_indices = @transform_0, window_bounds = array<i64: 8, 32>}, {transform_indices = @transform_1, window_bounds = array<i64: 8, 32>}, {pipeline_mode = #tpu.pipeline_mode<synchronous>, transform_indices = @transform_2, window_bounds = array<i64: 32, 32>}, {pipeline_mode = #tpu.pipeline_mode<synchronous>, transform_indices = @transform_3, window_bounds = array<i64: 3, 32>}, {transform_indices = @transform_4, window_bounds = array<i64: 8, 32>}]} {
    %c0 = arith.constant 0 : index
    %c0_0 = arith.constant 0 : index
    %0 = vector.load %arg1[%c0, %c0_0] : memref<8x32xf32, #tpu.memory_space<vmem>>, vector<8x32xf32>
    %c0_1 = arith.constant 0 : index
    %c0_2 = arith.constant 0 : index
    %1 = vector.load %arg3[%c0_1, %c0_2] : memref<32x32xf32, #tpu.memory_space<vmem>>, vector<32x32xf32>
    %cst = arith.constant dense<0.000000e+00> : vector<8x32xf32>
    %2 = tpu.matmul %0, %1, %cst {dimension_numbers = #tpu.dot_dimension_numbers<[1], [0], [0], [1], [0, 0, 1, 1], [], []>, precision = #tpu.contract_precision<fp32>} : vector<8x32xf32>, vector<32x32xf32>, vector<8x32xf32> -> vector<8x32xf32>
    %c0_3 = arith.constant 0 : index
    %c0_4 = arith.constant 0 : index
    %3 = vector.load %arg4[%c0_3, %c0_4] : memref<3x32xf32, #tpu.memory_space<vmem>>, vector<3x32xf32>
    %4 = vector.extract_strided_slice %3 {offsets = [0, 0], sizes = [1, 32], strides = [1, 1]} : vector<3x32xf32> to vector<1x32xf32>
    %5 = vector.broadcast %4 : vector<1x32xf32> to vector<8x32xf32>
    %6 = arith.addf %2, %5 : vector<8x32xf32>
    %c0_5 = arith.constant 0 : index
    %c0_6 = arith.constant 0 : index
    %7 = vector.load %arg2[%c0_5, %c0_6] : memref<8x32xf32, #tpu.memory_space<vmem>>, vector<8x32xf32>
    %8 = arith.addf %6, %7 : vector<8x32xf32>
    %cst_7 = arith.constant dense<0.000000e+00> : vector<8xf32>
    %9 = vector.multi_reduction <add>, %8, %cst_7 [1] : vector<8x32xf32> to vector<8xf32>
    %10 = vector.shape_cast %9 : vector<8xf32> to vector<8x1xf32>
    %cst_8 = arith.constant 3.200000e+01 : f32
    %11 = vector.broadcast %cst_8 : f32 to vector<8x1xf32>
    %12 = arith.divf %10, %11 : vector<8x1xf32>
    %13 = vector.broadcast %12 : vector<8x1xf32> to vector<8x32xf32>
    %14 = arith.subf %8, %13 : vector<8x32xf32>
    %15 = arith.mulf %14, %14 : vector<8x32xf32>
    %cst_9 = arith.constant dense<0.000000e+00> : vector<8xf32>
    %16 = vector.multi_reduction <add>, %15, %cst_9 [1] : vector<8x32xf32> to vector<8xf32>
    %17 = vector.shape_cast %16 : vector<8xf32> to vector<8x1xf32>
    %cst_10 = arith.constant 3.200000e+01 : f32
    %18 = vector.broadcast %cst_10 : f32 to vector<8x1xf32>
    %19 = arith.divf %17, %18 : vector<8x1xf32>
    %20 = vector.extract_strided_slice %3 {offsets = [1, 0], sizes = [1, 32], strides = [1, 1]} : vector<3x32xf32> to vector<1x32xf32>
    %cst_11 = arith.constant 9.99999996E-13 : f32
    %21 = vector.broadcast %cst_11 : f32 to vector<8x1xf32>
    %22 = arith.addf %19, %21 : vector<8x1xf32>
    %23 = math.rsqrt %22 : vector<8x1xf32>
    %24 = vector.broadcast %20 : vector<1x32xf32> to vector<8x32xf32>
    %25 = vector.broadcast %23 : vector<8x1xf32> to vector<8x32xf32>
    %26 = arith.mulf %24, %25 : vector<8x32xf32>
    %27 = arith.mulf %14, %26 : vector<8x32xf32>
    %28 = vector.extract_strided_slice %3 {offsets = [2, 0], sizes = [1, 32], strides = [1, 1]} : vector<3x32xf32> to vector<1x32xf32>
    %29 = vector.broadcast %28 : vector<1x32xf32> to vector<8x32xf32>
    %30 = arith.addf %27, %29 : vector<8x32xf32>
    %c0_12 = arith.constant 0 : index
    %c0_13 = arith.constant 0 : index
    %31 = vector.load %arg5[%c0_12, %c0_13] : memref<8x32xf32, #tpu.memory_space<vmem>>, vector<8x32xf32>
    tpu.vector_store %arg5[%c0_12, %c0_13], %30 {strides = array<i32>} : memref<8x32xf32, #tpu.memory_space<vmem>>, vector<8x32xf32>,
    return
  }
  func.func @transform_0(%arg0: i32) -> (i32, i32) {
    %c0_i32 = arith.constant 0 : i32
    %c0_i32_0 = arith.constant 0 : i32
    return %arg0, %c0_i32 : i32, i32
  }
  func.func @transform_1(%arg0: i32) -> (i32, i32) {
    %c0_i32 = arith.constant 0 : i32
    %c0_i32_0 = arith.constant 0 : i32
    return %arg0, %c0_i32 : i32, i32
  }
  func.func @transform_2(%arg0: i32) -> (i32, i32) {
    %c0_i32 = arith.constant 0 : i32
    %c0_i32_0 = arith.constant 0 : i32
    %c0_i32_1 = arith.constant 0 : i32
    return %c0_i32, %c0_i32_0 : i32, i32
  }
  func.func @transform_3(%arg0: i32) -> (i32, i32) {
    %c0_i32 = arith.constant 0 : i32
    %c0_i32_0 = arith.constant 0 : i32
    %c0_i32_1 = arith.constant 0 : i32
    return %c0_i32, %c0_i32_0 : i32, i32
  }
  func.func @transform_4(%arg0: i32) -> (i32, i32) {
    %c0_i32 = arith.constant 0 : i32
    %c0_i32_0 = arith.constant 0 : i32
    return %arg0, %c0_i32 : i32, i32
  }
}

</mosaic_0001>

<bundles_post_ra>
// kernel: tpu_custom_call.1
= control target key start
LH: loop header
LB: loop body
LE: loop exit
PB: predicated region body
PF: predicated region fallthrough
CT: control target
= control target key end

     0   :  { %s1590_s0 = inlined_call_operand.hbm [shape: f32[16,32], index: 0, kind: input, shape index: {}]   ;;  %s1591_s1 = inlined_call_operand.hbm [shape: f32[16,32], index: 1, kind: input, shape index: {}]   ;;  %s1592_s2 = inlined_call_operand.hbm [shape: f32[32,32], index: 2, kind: input, shape index: {}]   ;;  %s1593_s3 = inlined_call_operand.vmem [shape: f32[3,32], index: 3, kind: input, shape index: {}]   ;;  %s1594_s4 = inlined_call_operand.hbm [shape: f32[16,32], index: 4, kind: output, shape index: {}]  }
   0x1   :  { %1599 = sst [smem:[#allocation13_spill]] %s1592_s2 }
   0x2   :  { %9 = vsyncpa [#allocation3], 0 }
   0x3   :  { %11 = vsyncpa [#allocation3 + $0x1], 0 }
   0x4   :  { %12 = vsyncpa [#allocation6], 0 }
   0x5   :  { %14 = vsyncpa [#allocation6 + $0x1], 0 }
   0x6   :  { %15 = vsyncpa [#allocation4], 0 }
   0x7   :  { %17 = vsyncpa [#allocation4 + $0x1], 0  ;;  %s1322_s15 = smov 0   ;;  %s1324_s16 = smov 0  }
   0x8   :  { %s1326_s17 = smov 0   ;;  %s1328_s18 = smov 0  }
   0x9 LB: > { %s1343_s19 = sadd.s32 4294967295, %s1286_s18   ;;  %s906_s20 = sadd.s32 4294967294, %s1286_s18   ;;  %s1286_s18 = sphi %s1328_s18, %s1618_s18   ;;  %s1282_s17 = sphi %s1326_s17, %s1617_s17   ;;  %s1278_s16 = sphi %s1324_s16, %s1616_s16   ;;  %s1274_s15 = sphi %s1322_s15, %s1615_s15  }
   0xa   : > { %p43_p0 = scmp.ne.s32.totalorder %s1278_s16, %s1274_s15  ;;  %p1595_p1 = scmp.eq.s32.totalorder %s1343_s19, 0 }
   0xb   : > { %p141_p3 = scmp.eq.s32.totalorder %s906_s20, 1  ;;  %p907_p5 = scmp.ge.s32.totalorder %s1286_s18, 1 }
   0xc   : > { %p1352_p4 = por %p1595_p1, %p43_p0  ;;  %p148_p7 = scmp.lt.s32.totalorder %s1286_s18, 3 }
   0xd   : > { %p1357_p6 = por %p141_p3, %p43_p0  ;;  %s1288_s24 = smov [#allocation7]  }
   0xe   : > { %s1600_s21 = scalar_select %p1352_p4, 1, 0 }
   0xf   : > { %s1601_s22 = scalar_select %p1357_p6, 1, 0 }
  0x10   : > { %p1362_p8 = pnand %p907_p5, %p148_p7  ;;  %s160_s25 = sshll.u32 %s1288_s24, 4  ;;  %s1366_s25 = int_to_ptr.vmem [resolvable:$true] %s160_s25 }
  0x11   : > { %s1378_s27 = sadd.s32 1, %s1286_s18   ;;  %s30_s28 = sadd.s32 1, %s1282_s17 }
  0x12   : > { %s1602_s23 = scalar_select %p1362_p8, 1, 0 }
  0x13   : > { %p1065_p9 = pneg %p1362_p8  ;;  %s27_s29 = ssub.s32 %s1286_s18, %s1378_s27 }
  0x14   : > { %s1604_s2 = sld [smem:[#allocation13_spill]] }
  0x15   : > { %p1373_p11 = pnand %p1065_p9, %p1595_p1 }
  0x17   : > { %p1126_p13 = pneg %p1373_p11 }
  0x1a   : > { %s1124_s6 = scalar_lea.hbm %s1604_s2, 512 }
  0x1b   : > { %p1125_p12 = scmp.ne.s32.totalorder %s1604_s2, %s1124_s6  ;;  %p1131_p5 = scmp.lt.u32.totalorder %s1124_s6, %s1604_s2 }
  0x1d   : > { %p1127_p0 = pnand %p1126_p13, %p1125_p12 }
  0x1f   : > { %p1128_p3 = pneg %p1127_p0 }
  0x21   : > { %p1133_p7 = pnand %p1131_p5, %p1128_p3 }
  0x23   : > { %1136 = shalt.err (!%p1133_p7)
}
  0x24   : > { %s1137_s11 = scalar_lea.vmem %s1366_s25, 512  ;;  %p1145_p2 = scmp.lt.s32.totalorder %s1366_s25, %s1366_s25 }
  0x25   : > { %p1138_p9 = scmp.ne.s32.totalorder %s1366_s25, %s1137_s11  ;;  %p1146_p6 = scmp.lt.s32.totalorder %s1137_s11, %s1137_s11 }
  0x27   : > { %p1140_p10 = pnand %p1138_p9, %p1126_p13  ;;  %p1147_p4 = por %p1146_p6, %p1145_p2 }
  0x29   : > { %p1141_p1 = pneg %p1140_p10 }
  0x2b   : > { %p1148_p8 = pnand %p1147_p4, %p1141_p1 }
  0x2d   : > { %1151 = shalt.err (!%p1148_p8)
}
  0x2e   : > { %s1289_s12 = smov 128   ;;  %s1290_s13 = smov 8  }
  0x2f   : > { %1068 = dma.hbm_to_vmem [thread:$0]  (!%p1373_p11), %s1604_s2, 512, %s1366_s25, [#allocation6], %s1289_s12, %s1289_s12, %s1290_s13  }
  0x30   : > { %p28_p2 = scmp.eq.s32.totalorder %s27_s29, 0  ;;  %p37_p1 = scmp.ne.s32.totalorder %s1282_s17, %s1278_s16 }
  0x31   : > { %p38_p4 = scmp.eq.s32.totalorder %s1286_s18, 0  ;;  %p1081_p6 = scmp.lt.s32.totalorder %s1286_s18, 2 }
  0x32   : > { %s1409_s24 = scalar_select %p28_p2, %s1282_s17, %s30_s28  }
  0x33   : > { %p39_p8 = por %p38_p4, %p37_p1  ;;  %p1605_p10 = scmp.eq.s32.totalorder %s1343_s19, 1 }
  0x34   : > { %s177_s5 = sand.u32 1, %s1282_s17   ;;  %s911_s6 = sshll.u32 %s1286_s18, 7 }
  0x35   : > { %p1413_p12 = por %p1605_p10, %p37_p1  ;;  %s1419_s7 = sshll.u32 %s177_s5, 3 }
  0x36   : > { %s1424_s25 = scalar_lea.hbm %s1590_s0, %s911_s6  ;;  %s181_s28 = scalar_lea.vmem [#allocation2], %s1419_s7 }
  0x37   : > { %s1606_s30 = scalar_select %p1413_p12, 1, 0 }
  0x38   : > { %s188_s29 = sshll.u32 %s181_s28, 4  ;;  %p1427_p11 = pnand %p1081_p6, %p39_p8  ;;  %s1431_s29 = int_to_ptr.vmem [resolvable:$true] %s188_s29 }
  0x39   : > { %s1436_s12 = scalar_lea.hbm %s1591_s1, %s911_s6  ;;  %s178_s13 = scalar_lea.sflag [#allocation3], %s177_s5 }
  0x3a   : > { %s1152_s14 = scalar_lea.hbm %s1424_s25, 128  ;;  %p1154_p0 = pneg %p1427_p11 }
  0x3b   : > { %p1153_p13 = scmp.ne.s32.totalorder %s1424_s25, %s1152_s14  ;;  %s1157_s8 = scalar_lea.hbm %s1590_s0, 256 }
  0x3c   : > { %p1158_p7 = scmp.lt.u32.totalorder %s1424_s25, %s1590_s0  ;;  %p1159_p9 = scmp.lt.u32.totalorder %s1157_s8, %s1152_s14 }
  0x3d   : > { %p1155_p3 = pnand %p1154_p0, %p1153_p13  ;;  %p1161_p1 = scmp.lt.u32.totalorder %s1152_s14, %s1424_s25 }
  0x3e   : > { %p1160_p2 = por %p1159_p9, %p1158_p7 }
  0x3f   : > { %p1156_p5 = pneg %p1155_p3 }
  0x40   : > { %p1162_p4 = por %p1161_p1, %p1160_p2 }
  0x42   : > { %p1163_p6 = pnand %p1162_p4, %p1156_p5 }
  0x44   : > { %1166 = shalt.err (!%p1163_p6)
}
  0x45   : > { %s1167_s5 = scalar_lea.vmem %s1431_s29, 128  ;;  %s1291_s6 = smov [#allocation2]  }
  0x46   : > { %p1168_p8 = scmp.ne.s32.totalorder %s1431_s29, %s1167_s5  ;;  %s1172_s10 = sshll.u32 %s1291_s6, 4  ;;  %s1173_s10 = int_to_ptr.vmem [resolvable:$false] %s1172_s10 }
  0x47   : > { %s1174_s2 = scalar_lea.vmem %s1173_s10, 256  ;;  %p1175_p3 = scmp.lt.s32.totalorder %s1431_s29, %s1173_s10 }
  0x48   : > { %p1170_p10 = pnand %p1168_p8, %p1154_p0  ;;  %p1176_p7 = scmp.lt.s32.totalorder %s1174_s2, %s1167_s5 }
  0x4a   : > { %p1171_p13 = pneg %p1170_p10  ;;  %p1177_p9 = por %p1176_p7, %p1175_p3 }
  0x4c   : > { %p1178_p2 = pnand %p1177_p9, %p1171_p13 }
  0x4e   : > { %1181 = shalt.err (!%p1178_p2)
}
  0x4f   : > { %1072 = dma.hbm_to_vmem [thread:$0]  (!%p1427_p11), %s1424_s25, 128, %s1431_s29, %s178_s13  }
  0x50   : > { %s195_s11 = sand.u32 1, %s1286_s18   ;;  %s199_s14 = scalar_lea.vmem [#allocation5], %s1419_s7 }
  0x51   : > { %s206_s20 = sshll.u32 %s199_s14, 4  ;;  %s196_s26 = scalar_lea.sflag [#allocation6], %s195_s11  ;;  %s207_s20 = int_to_ptr.vmem [resolvable:$true] %s206_s20 }
  0x52   : > { %s1182_s8 = scalar_lea.hbm %s1436_s12, 128  ;;  %s1187_s6 = scalar_lea.hbm %s1591_s1, 256 }
  0x53   : > { %p1183_p5 = scmp.ne.s32.totalorder %s1436_s12, %s1182_s8  ;;  %p1188_p6 = scmp.lt.u32.totalorder %s1436_s12, %s1591_s1 }
  0x54   : > { %p1189_p8 = scmp.lt.u32.totalorder %s1187_s6, %s1182_s8  ;;  %p1191_p13 = scmp.lt.u32.totalorder %s1182_s8, %s1436_s12 }
  0x55   : > { %p1185_p1 = pnand %p1183_p5, %p1154_p0 }
  0x56   : > { %p1190_p10 = por %p1189_p8, %p1188_p6 }
  0x57   : > { %p1186_p4 = pneg %p1185_p1 }
  0x58   : > { %p1192_p3 = por %p1191_p13, %p1190_p10 }
  0x5a   : > { %p1193_p7 = pnand %p1192_p3, %p1186_p4 }
  0x5c   : > { %1196 = shalt.err (!%p1193_p7)
}
  0x5d   : > { %s1197_s7 = scalar_lea.vmem %s207_s20, 128  ;;  %s1292_s25 = smov [#allocation5]  }
  0x5e   : > { %p1198_p9 = scmp.ne.s32.totalorder %s207_s20, %s1197_s7  ;;  %s1202_s29 = sshll.u32 %s1292_s25, 4  ;;  %s1203_s29 = int_to_ptr.vmem [resolvable:$false] %s1202_s29 }
  0x5f   : > { %s1204_s13 = scalar_lea.vmem %s1203_s29, 256  ;;  %p1205_p1 = scmp.lt.s32.totalorder %s207_s20, %s1203_s29 }
  0x60   : > { %p1200_p2 = pnand %p1198_p9, %p1154_p0  ;;  %p1206_p12 = scmp.lt.s32.totalorder %s1204_s13, %s1197_s7 }
  0x62   : > { %p1201_p5 = pneg %p1200_p2  ;;  %p1207_p6 = por %p1206_p12, %p1205_p1 }
  0x64   : > { %p1208_p8 = pnand %p1207_p6, %p1201_p5 }
  0x66   : > { %1211 = shalt.err (!%p1208_p8)
}
  0x67   : > { %1075 = dma.hbm_to_vmem [thread:$0]  (!%p1427_p11), %s1436_s12, 128, %s207_s20, %s196_s26  }
  0x68   : > { %p1608_p4 = scmp.ne.s32.totalorder %s1602_s23, 0 }
  0x69   : > { %s1487_s11 = sand.u32 (!%p1608_p4), 1, %s1278_s16   ;;  %p1609_p12 = scmp.ne.s32.totalorder (!%p1608_p4), %s1600_s21, 0 }
  0x6a   : > { %215 = sbr.rel (%p1608_p4) target bundleno = 699 (0x2bb), region = 36  ;;  %s1490_s14 = sshll.u32 (!%p1608_p4), %s1487_s11, 3 }
  0x6b   : > { %s218_s8 = scalar_lea.sflag (!%p1608_p4), [#allocation3], %s1487_s11  ;;  %s221_s28 = scalar_lea.vmem (!%p1608_p4), [#allocation2], %s1490_s14 }
  0x71   : > { %1257 = dma.done.wait (%p1609_p12), %s218_s8, 128  }
  0x72   : > { %1259 = vsyncadd (%p1609_p12), %s218_s8, 4294967168  ;;  %s226_s23 = sand.u32 1, %s1343_s19   ;;  %s230_s12 = scalar_lea.vmem [#allocation5], %s1490_s14 }
  0x73   : > { %s227_s9 = scalar_lea.sflag [#allocation6], %s226_s23 }
  0x74   : > { %1261 = dma.done.wait (%p1609_p12), %s227_s9, 128  }
  0x75   : > { %1263 = vsyncadd (%p1609_p12), %s227_s9, 4294967168  ;;  %p1610_p11 = scmp.eq.s32.totalorder %s1343_s19, 0 }
  0x77   : > { %1265 = dma.done.wait (%p1610_p11), [#allocation6], 512   ;;  %p1611_p0 = pmov %p1610_p11 }
  0x78   : > { %v1293_v0 = vmov 0.0|0.0   ;;  %vm1294_vm0 = vmmov 0   ;;  %v1295_v1 = vmov 0.0   ;;  %vm274_vm1 = vcmask 261120   ;;  %v265_v2 = vld [vmem:[#allocation7] sm:$0xff]  ;;  %v266_v3 = vld [vmem:[#allocation7 + $0x8] sm:$0xff] }
  0x79   : > { %1267 = vsyncadd (%p1611_p0), [#allocation6], 4294966784  ;;  %1019 = vmatprep.subr.bf16.mxu0 %v1293_v0  ;;  %1025 = vmatprep.subr.bf16.mxu1 %v1293_v0  ;;  %v267_v4 = vld [vmem:[#allocation7 + $0x10] sm:$0xff]  ;;  %v279_v5 = vand.u32 4294901760, %v265_v2  ;;  %v282_v6 = vand.u32 4294901760, %v266_v3  ;;  %v268_v7 = vld [vmem:[#allocation7 + $0x18] sm:$0xff]  ;;  %v270_v41 = vlaneseq }
  0x7a   : > { %961 = vmatprep.mubr.msk.f32.mxu0 %vm1294_vm0, %v1295_v1  ;;  %972 = vmatprep.mubr.msk.f32.mxu1 %vm1294_vm0, %v1295_v1  ;;  %v285_v8 = vand.u32 4294901760, %v267_v4  ;;  %v264_v9 = vld [vmem:[%s221_s28] sm:$0xff]  ;;  %v288_v10 = vand.u32 4294901760, %v268_v7  ;;  %v763_v62 = vld [vmem:[%s230_s12] sm:$0xff]  ;;  %s920_s26 = sshll.u32 %s1343_s19, 7  ;;  %s263_s5 = scalar_lea.vmem [#allocation8], %s1490_s14 }
  0x7b   : > { %v276_v11 = vsel %vm274_vm1, %v264_v9, 0  ;;  %v1020_v12 = vpack.c.bf16 %v282_v6, %v279_v5  ;;  %v359_v13 = vsub.f32 %v265_v2, %v279_v5  ;;  %v366_v14 = vsub.f32 %v266_v3, %v282_v6  ;;  %v269_v44 = vld [vmem:[%s1593_s3] sm:$0x7]  ;;  %s804_s6 = sshll.u32 %s263_s5, 4  ;;  %s1545_s7 = scalar_lea.hbm %s1594_s4, %s920_s26  ;;  %s1547_s6 = int_to_ptr.vmem [resolvable:$true] %s804_s6 }
  0x7c   : > { %v373_v15 = vsub.f32 %v267_v4, %v285_v8  ;;  %v380_v16 = vsub.f32 %v268_v7, %v288_v10  ;;  %v347_v17 = vand.u32 4294901760, %v276_v11  ;;  %v1023_v18 = vpack.c.bf16 %v288_v10, %v285_v8  ;;  %s791_s25 = scalar_lea.sflag [#allocation4], %s1487_s11  ;;  %s1212_s29 = scalar_lea.vmem %s1547_s6, 128 }
  0x7d   : > { %1021 = vmatpush3.bf16.msra.mxu0 %v1020_v12  ;;  %v360_v19 = vand.u32 4294901760, %v359_v13  ;;  %v367_v20 = vand.u32 4294901760, %v366_v14  ;;  %v1032_v35 = vpack.c.bf16 %v366_v14, %v359_v13  ;;  %v271_v42 = vshrl.u32 %v270_v41, 7  ;;  %p1213_p10 = scmp.ne.s32.totalorder %s1547_s6, %s1212_s29  ;;  %p1612_p13 = scmp.ne.s32.totalorder %s1606_s30, 0 }
  0x7e   : > { %v374_v21 = vand.u32 4294901760, %v373_v15  ;;  %1022 = vmatprep.subr.bf16.mxu0 %v1293_v0  ;;  %v348_v22 = vsub.f32 %v276_v11, %v347_v17  ;;  %v381_v23 = vand.u32 4294901760, %v380_v16  ;;  %v1035_v38 = vpack.c.bf16 %v380_v16, %v373_v15  ;;  %s1296_s19 = smov [#allocation8]  }
  0x7f   : > { %v361_v24 = vsub.f32 %v359_v13, %v360_v19  ;;  %v368_v25 = vsub.f32 %v366_v14, %v367_v20  ;;  %v1044_v39 = vpack.c.bf16 %v367_v20, %v360_v19  ;;  %v272_v43 = vsub.s32 0, %v271_v42  ;;  %p1214_p3 = pnand %p1213_p10, %p1612_p13  ;;  %s1216_s13 = sshll.u32 %s1296_s19, 4  ;;  %s1217_s13 = int_to_ptr.vmem [resolvable:$false] %s1216_s13 }
  0x80   : > { %v375_v26 = vsub.f32 %v373_v15, %v374_v21  ;;  %v349_v27 = vand.u32 4294901760, %v348_v22  ;;  %v382_v28 = vsub.f32 %v380_v16, %v381_v23  ;;  %v1047_v40 = vpack.c.bf16 %v381_v23, %v374_v21  ;;  %s1218_s14 = scalar_lea.vmem %s1217_s13, 256  ;;  %p1219_p9 = scmp.lt.s32.totalorder %s1547_s6, %s1217_s13 }
  0x81   : > { %1024 = vmatpush3.bf16.msra.mxu0 %v1023_v18  ;;  %v362_v29 = vand.u32 4294901760, %v361_v24  ;;  %v369_v30 = vand.u32 4294901760, %v368_v25  ;;  %v273_v45 = vrot.slane %v269_v44, %v272_v43  ;;  %v780_v11 = vsub.s32 1, %v271_v42  ;;  %p1215_p7 = pneg %p1214_p3  ;;  %p1220_p2 = scmp.lt.s32.totalorder %s1218_s14, %s1212_s29 }
  0x82   : > { %v376_v31 = vand.u32 4294901760, %v375_v26  ;;  %1031 = vmatprep.subr.bf16.mxu0 %v1293_v0  ;;  %v350_v32 = vsub.f32 %v348_v22, %v349_v27  ;;  %v383_v33 = vand.u32 4294901760, %v382_v28  ;;  %v786_v13 = vsub.s32 2, %v271_v42 }
  0x83   : > { %v1026_v34 = vpack.c.bf16 %v369_v30, %v362_v29  ;;  %p1221_p5 = por %p1220_p2, %p1219_p9 }
  0x84   : > { %v351_v36 = vand.u32 4294901760, %v350_v32  ;;  %v1029_v37 = vpack.c.bf16 %v383_v33, %v376_v31  ;;  %v787_v15 = vrot.slane %v269_v44, %v786_v13 }
  0x85   : > { %1027 = vmatpush3.bf16.msra.mxu1 %v1026_v34  ;;  %p1222_p1 = pnand %p1221_p5, %p1215_p7 }
  0x86   : > { %962 = vmatmul.mubr.f32.vlgmr.msra.gmra.mrb[0].mxu0 %v351_v36  ;;  %1028 = vmatprep.subr.bf16.mxu1 %v1293_v0 }
  0x87   : > { %1033 = vmatpush3.bf16.msra.mxu0 %v1032_v35  ;;  %983 = vmatprep.mubr.msk.f32.mxu0 %vm1294_vm0, %v1295_v1 }
  0x88   : > { %1034 = vmatprep.subr.bf16.mxu0 %v1293_v0 }
  0x89   : > { %1030 = vmatpush3.bf16.msra.mxu1 %v1029_v37 }
  0x8a   : > { %1037 = vmatprep.subr.bf16.mxu1 %v1293_v0 }
  0x8b   : > { %1036 = vmatpush3.bf16.msra.mxu0 %v1035_v38 }
  0x8c   : > { %973 = vmatmul.mubr.f32.vlgmr.msra.gmra.mrb[0].mxu1 %v347_v17  ;;  %1043 = vmatprep.subr.bf16.mxu0 %v1293_v0 }
  0x8d   : > { %1039 = vmatpush3.bf16.msra.mxu1 %v1020_v12  ;;  %994 = vmatprep.mubr.msk.f32.mxu1 %vm1294_vm0, %v1295_v1 }
  0x8e   : > { %984 = vmatmul.mubr.f32.vlgmr.msra.gmra.mrb[2].mxu0 %v348_v22  ;;  %1040 = vmatprep.subr.bf16.mxu1 %v1293_v0 }
  0x8f   : > { %1045 = vmatpush3.bf16.msra.mxu0 %v1044_v39  ;;  %1005 = vmatprep.mubr.msk.f32.mxu0 %vm1294_vm0, %v1295_v1 }
  0x90   : > { %1046 = vmatprep.subr.bf16.mxu0 %v1293_v0 }
  0x91   : > { %1042 = vmatpush3.bf16.msra.mxu1 %v1023_v18 }
  0x92   : > { %1049 = vmatprep.subr.bf16.mxu1 %v1293_v0 }
  0x93   : > { %1048 = vmatpush3.bf16.msra.mxu0 %v1047_v40 }
  0x94   : > { %995 = vmatmul.mubr.f32.vlgmr.msra.gmra.mrb[2].mxu1 %v349_v27 }
  0x95   : > { %1051 = vmatpush3.bf16.msra.mxu1 %v1020_v12  ;;  %1016 = vmatprep.mubr.msk.f32.mxu1 %vm1294_vm0, %v1295_v1  ;;  %v781_v12 = vrot.slane %v269_v44, %v780_v11 }
  0x96   : > { %1006 = vmatmul.mubr.f32.vlgmr.msra.gmra.mrb[4].mxu0 %v347_v17  ;;  %1052 = vmatprep.subr.bf16.mxu1 %v1293_v0 }
  0x99   : > { %1054 = vmatpush3.bf16.msra.mxu1 %v1023_v18 }
  0x9c   : > { %1017 = vmatmul.mubr.f32.vlgmr.msra.gmra.mrb[4].mxu1 %v347_v17 }
 0x159   : > { %v353_v46 = vpop.f32.mrb[0].mxu0 }
 0x15a   : > { %v963_v47 = vpop.f32.mrb[1].mxu0  ;;  %v354_v48 = vadd.f32 %v353_v46, %v273_v45 }
 0x15f   : > { %v444_v49 = vpop.f32.mrb[0].mxu1 }
 0x160   : > { %v445_v50 = vadd.f32 %v444_v49, %v354_v48  ;;  %v974_v51 = vpop.f32.mrb[1].mxu1 }
 0x161   : > { %v524_v52 = vpop.f32.mrb[2].mxu0 }
 0x162   : > { %v525_v53 = vadd.f32 %v524_v52, %v445_v50  ;;  %v985_v54 = vpop.f32.mrb[3].mxu0 }
 0x167   : > { %v601_v55 = vpop.f32.mrb[2].mxu1 }
 0x168   : > { %v602_v56 = vadd.f32 %v601_v55, %v525_v53  ;;  %v996_v57 = vpop.f32.mrb[3].mxu1 }
 0x169   : > { %v684_v58 = vpop.f32.mrb[4].mxu0 }
 0x16a   : > { %v685_v59 = vadd.f32 %v684_v58, %v602_v56  ;;  %v1007_v60 = vpop.f32.mrb[5].mxu0 }
 0x16f   : > { %v759_v61 = vpop.f32.mrb[4].mxu1 }
 0x170   : > { %v760_v63 = vadd.f32 %v759_v61, %v685_v59  ;;  %v1018_v0 = vpop.f32.mrb[5].mxu1 }
 0x172   : > { %v764_v1 = vadd.f32 %v763_v62, %v760_v63 }
 0x174   : > { %v765_v2 = vsel %vm274_vm1, %v764_v1, 0.0 }
 0x175   : > { %766 = vadd.xlane.f32.xlu0 %v765_v2 }
 0x202   : > { %v767_v3 = vpop.xlane.xlu0 %766 }
 0x203   : > { %v769_v4 = vmul.f32 0.03125, %v767_v3 }
 0x205   : > { %v770_v5 = vsub.f32 %v764_v1, %v769_v4 }
 0x207   : > { %v771_v6 = vmul.f32 %v770_v5, %v770_v5 }
 0x209   : > { %v772_v7 = vsel %vm274_vm1, %v771_v6, 0.0 }
 0x20a   : > { %773 = vadd.xlane.f32.xlu0 %v772_v7 }
 0x297   : > { %v774_v8 = vpop.xlane.xlu0 %773 }
 0x298   : > { %v775_v9 = vmul.f32 0.03125, %v774_v8 }
 0x29a   : > { %v776_v10 = vadd.f32 1e-12, %v775_v9 }
 0x29c   : > { %1122 = vrsqrt.f32 %v776_v10 }
 0x2a6   : > { %v1123_v14 = vpop.eup %1122 }
 0x2a7   : > { %v782_v16 = vmul.f32 %v1123_v14, %v781_v12 }
 0x2a9   : > { %v783_v17 = vmul.f32 %v782_v16, %v770_v5 }
 0x2ab   : > { %v788_v18 = vadd.f32 %v787_v15, %v783_v17 }
 0x2ad   : > { %789 = vst.msk [vmem:[%s263_s5] sm:$0xff] %vm274_vm1, %v788_v18 }
 0x2ae   : > { %1225 = shalt.err (!%p1222_p1)
}
 0x2af   : > { %s1226_s11 = scalar_lea.hbm %s1545_s7, 128  ;;  %s1230_s23 = scalar_lea.hbm %s1594_s4, 256 }
 0x2b0   : > { %p1227_p6 = scmp.ne.s32.totalorder %s1545_s7, %s1226_s11  ;;  %p1231_p12 = scmp.lt.u32.totalorder %s1545_s7, %s1594_s4 }
 0x2b1   : > { %p1232_p11 = scmp.lt.u32.totalorder %s1230_s23, %s1226_s11  ;;  %p1234_p10 = scmp.lt.u32.totalorder %s1226_s11, %s1545_s7 }
 0x2b2   : > { %p1228_p8 = pnand %p1227_p6, %p1612_p13 }
 0x2b3   : > { %p1233_p0 = por %p1232_p11, %p1231_p12 }
 0x2b4   : > { %p1229_p4 = pneg %p1228_p8 }
 0x2b5   : > { %p1235_p3 = por %p1234_p10, %p1233_p0 }
 0x2b7   : > { %p1236_p7 = pnand %p1235_p3, %p1229_p4 }
 0x2b9   : > { %1239 = shalt.err (!%p1236_p7)
}
 0x2ba   : > { %1063 = dma.vmem_to_hbm [thread:$0]  (%p1612_p13), %s1547_s6, 128, %s1545_s7, %s791_s25  }
 0x2bb PF: > { %s816_s21 = sand.u32 1, %s1274_s15   ;;  %p1613_p9 = scmp.ne.s32.totalorder %s1601_s22, 0 }
 0x2bc   : > { %p1614_p2 = scmp.ge.s32.totalorder %s1286_s18, 2  ;;  %s817_s20 = scalar_lea.sflag [#allocation4], %s816_s21 }
 0x2be   : > { %p1077_p5 = pnand %p1614_p2, %p1613_p9 }
 0x2c0   : > { %1269 = dma.done.wait (!%p1077_p5), %s817_s20, 128  }
 0x2c1   : > { %1271 = vsyncadd (!%p1077_p5), %s817_s20, 4294967168  ;;  %p20_p1 = scmp.ge.s32.totalorder %s1378_s27, 4   ;;  %s1615_s15 = smov %s1278_s16 }
 0x2c2   : > { %s1616_s16 = smov %s1282_s17  ;;  %s1617_s17 = smov %s1409_s24 }
 0x2c3   : > { %s1618_s18 = smov %s1378_s27  ;;  %22 = sbr.rel (!%p20_p1) target bundleno = 9 (0x9), region = 98 }
 0x2ca   :  { %822 = vsyncpa [#allocation3], 1 }
 0x2cb   :  { %824 = vsyncpa [#allocation3 + $0x1], 1 }
 0x2cc   :  { %825 = vsyncpa [#allocation6], 1 }
 0x2cd   :  { %827 = vsyncpa [#allocation6 + $0x1], 1 }
 0x2ce   :  { %828 = vsyncpa [#allocation4], 1 }
 0x2cf   :  { %830 = vsyncpa [#allocation4 + $0x1], 1 }

// kernel: tpu_custom_call.1
= control target key start
LH: loop header
LB: loop body
LE: loop exit
PB: predicated region body
PF: predicated region fallthrough
CT: control target
= control target key end

     0   :  { %s1590_s0 = inlined_call_operand.hbm [shape: f32[16,32], index: 0, kind: input, shape index: {}]   ;;  %s1591_s1 = inlined_call_operand.hbm [shape: f32[16,32], index: 1, kind: input, shape index: {}]   ;;  %s1592_s2 = inlined_call_operand.hbm [shape: f32[32,32], index: 2, kind: input, shape index: {}]   ;;  %s1593_s3 = inlined_call_operand.vmem [shape: f32[3,32], index: 3, kind: input, shape index: {}]   ;;  %s1594_s4 = inlined_call_operand.hbm [shape: f32[16,32], index: 4, kind: output, shape index: {}]  }
   0x1   :  { %1599 = sst [smem:[#allocation13_spill]] %s1592_s2 }
   0x2   :  { %9 = vsyncpa [#allocation3], 0 }
   0x3   :  { %11 = vsyncpa [#allocation3 + $0x1], 0 }
   0x4   :  { %12 = vsyncpa [#allocation6], 0 }
   0x5   :  { %14 = vsyncpa [#allocation6 + $0x1], 0 }
   0x6   :  { %15 = vsyncpa [#allocation4], 0 }
   0x7   :  { %17 = vsyncpa [#allocation4 + $0x1], 0  ;;  %s1322_s15 = smov 0   ;;  %s1324_s16 = smov 0  }
   0x8   :  { %s1326_s17 = smov 0   ;;  %s1328_s18 = smov 0  }
   0x9 LB: > { %s1343_s19 = sadd.s32 4294967295, %s1286_s18   ;;  %s906_s20 = sadd.s32 4294967294, %s1286_s18   ;;  %s1286_s18 = sphi %s1328_s18, %s1618_s18   ;;  %s1282_s17 = sphi %s1326_s17, %s1617_s17   ;;  %s1278_s16 = sphi %s1324_s16, %s1616_s16   ;;  %s1274_s15 = sphi %s1322_s15, %s1615_s15  }
   0xa   : > { %p43_p0 = scmp.ne.s32.totalorder %s1278_s16, %s1274_s15  ;;  %p1595_p1 = scmp.eq.s32.totalorder %s1343_s19, 0 }
   0xb   : > { %p141_p3 = scmp.eq.s32.totalorder %s906_s20, 1  ;;  %p907_p5 = scmp.ge.s32.totalorder %s1286_s18, 1 }
   0xc   : > { %p1352_p4 = por %p1595_p1, %p43_p0  ;;  %p148_p7 = scmp.lt.s32.totalorder %s1286_s18, 3 }
   0xd   : > { %p1357_p6 = por %p141_p3, %p43_p0  ;;  %s1288_s24 = smov [#allocation7]  }
   0xe   : > { %s1600_s21 = scalar_select %p1352_p4, 1, 0 }
   0xf   : > { %s1601_s22 = scalar_select %p1357_p6, 1, 0 }
  0x10   : > { %p1362_p8 = pnand %p907_p5, %p148_p7  ;;  %s160_s25 = sshll.u32 %s1288_s24, 4  ;;  %s1366_s25 = int_to_ptr.vmem [resolvable:$true] %s160_s25 }
  0x11   : > { %s1378_s27 = sadd.s32 1, %s1286_s18   ;;  %s30_s28 = sadd.s32 1, %s1282_s17 }
  0x12   : > { %s1602_s23 = scalar_select %p1362_p8, 1, 0 }
  0x13   : > { %p1065_p9 = pneg %p1362_p8  ;;  %s27_s29 = ssub.s32 %s1286_s18, %s1378_s27 }
  0x14   : > { %s1604_s2 = sld [smem:[#allocation13_spill]] }
  0x15   : > { %p1373_p11 = pnand %p1065_p9, %p1595_p1 }
  0x17   : > { %p1126_p13 = pneg %p1373_p11 }
  0x1a   : > { %s1124_s6 = scalar_lea.hbm %s1604_s2, 512 }
  0x1b   : > { %p1125_p12 = scmp.ne.s32.totalorder %s1604_s2, %s1124_s6  ;;  %p1131_p5 = scmp.lt.u32.totalorder %s1124_s6, %s1604_s2 }
  0x1d   : > { %p1127_p0 = pnand %p1126_p13, %p1125_p12 }
  0x1f   : > { %p1128_p3 = pneg %p1127_p0 }
  0x21   : > { %p1133_p7 = pnand %p1131_p5, %p1128_p3 }
  0x23   : > { %1136 = shalt.err (!%p1133_p7)
}
  0x24   : > { %s1137_s11 = scalar_lea.vmem %s1366_s25, 512  ;;  %p1145_p2 = scmp.lt.s32.totalorder %s1366_s25, %s1366_s25 }
  0x25   : > { %p1138_p9 = scmp.ne.s32.totalorder %s1366_s25, %s1137_s11  ;;  %p1146_p6 = scmp.lt.s32.totalorder %s1137_s11, %s1137_s11 }
  0x27   : > { %p1140_p10 = pnand %p1138_p9, %p1126_p13  ;;  %p1147_p4 = por %p1146_p6, %p1145_p2 }
  0x29   : > { %p1141_p1 = pneg %p1140_p10 }
  0x2b   : > { %p1148_p8 = pnand %p1147_p4, %p1141_p1 }
  0x2d   : > { %1151 = shalt.err (!%p1148_p8)
}
  0x2e   : > { %s1289_s12 = smov 128   ;;  %s1290_s13 = smov 8  }
  0x2f   : > { %1068 = dma.hbm_to_vmem [thread:$0]  (!%p1373_p11), %s1604_s2, 512, %s1366_s25, [#allocation6], %s1289_s12, %s1289_s12, %s1290_s13  }
  0x30   : > { %p28_p2 = scmp.eq.s32.totalorder %s27_s29, 0  ;;  %p37_p1 = scmp.ne.s32.totalorder %s1282_s17, %s1278_s16 }
  0x31   : > { %p38_p4 = scmp.eq.s32.totalorder %s1286_s18, 0  ;;  %p1081_p6 = scmp.lt.s32.totalorder %s1286_s18, 2 }
  0x32   : > { %s1409_s24 = scalar_select %p28_p2, %s1282_s17, %s30_s28  }
  0x33   : > { %p39_p8 = por %p38_p4, %p37_p1  ;;  %p1605_p10 = scmp.eq.s32.totalorder %s1343_s19, 1 }
  0x34   : > { %s177_s5 = sand.u32 1, %s1282_s17   ;;  %s911_s6 = sshll.u32 %s1286_s18, 7 }
  0x35   : > { %p1413_p12 = por %p1605_p10, %p37_p1  ;;  %s1419_s7 = sshll.u32 %s177_s5, 3 }
  0x36   : > { %s1424_s25 = scalar_lea.hbm %s1590_s0, %s911_s6  ;;  %s181_s28 = scalar_lea.vmem [#allocation2], %s1419_s7 }
  0x37   : > { %s1606_s30 = scalar_select %p1413_p12, 1, 0 }
  0x38   : > { %s188_s29 = sshll.u32 %s181_s28, 4  ;;  %p1427_p11 = pnand %p1081_p6, %p39_p8  ;;  %s1431_s29 = int_to_ptr.vmem [resolvable:$true] %s188_s29 }
  0x39   : > { %s1436_s12 = scalar_lea.hbm %s1591_s1, %s911_s6  ;;  %s178_s13 = scalar_lea.sflag [#allocation3], %s177_s5 }
  0x3a   : > { %s1152_s14 = scalar_lea.hbm %s1424_s25, 128  ;;  %p1154_p0 = pneg %p1427_p11 }
  0x3b   : > { %p1153_p13 = scmp.ne.s32.totalorder %s1424_s25, %s1152_s14  ;;  %s1157_s8 = scalar_lea.hbm %s1590_s0, 256 }
  0x3c   : > { %p1158_p7 = scmp.lt.u32.totalorder %s1424_s25, %s1590_s0  ;;  %p1159_p9 = scmp.lt.u32.totalorder %s1157_s8, %s1152_s14 }
  0x3d   : > { %p1155_p3 = pnand %p1154_p0, %p1153_p13  ;;  %p1161_p1 = scmp.lt.u32.totalorder %s1152_s14, %s1424_s25 }
  0x3e   : > { %p1160_p2 = por %p1159_p9, %p1158_p7 }
  0x3f   : > { %p1156_p5 = pneg %p1155_p3 }
  0x40   : > { %p1162_p4 = por %p1161_p1, %p1160_p2 }
  0x42   : > { %p1163_p6 = pnand %p1162_p4, %p1156_p5 }
  0x44   : > { %1166 = shalt.err (!%p1163_p6)
}
  0x45   : > { %s1167_s5 = scalar_lea.vmem %s1431_s29, 128  ;;  %s1291_s6 = smov [#allocation2]  }
  0x46   : > { %p1168_p8 = scmp.ne.s32.totalorder %s1431_s29, %s1167_s5  ;;  %s1172_s10 = sshll.u32 %s1291_s6, 4  ;;  %s1173_s10 = int_to_ptr.vmem [resolvable:$false] %s1172_s10 }
  0x47   : > { %s1174_s2 = scalar_lea.vmem %s1173_s10, 256  ;;  %p1175_p3 = scmp.lt.s32.totalorder %s1431_s29, %s1173_s10 }
  0x48   : > { %p1170_p10 = pnand %p1168_p8, %p1154_p0  ;;  %p1176_p7 = scmp.lt.s32.totalorder %s1174_s2, %s1167_s5 }
  0x4a   : > { %p1171_p13 = pneg %p1170_p10  ;;  %p1177_p9 = por %p1176_p7, %p1175_p3 }
  0x4c   : > { %p1178_p2 = pnand %p1177_p9, %p1171_p13 }
  0x4e   : > { %1181 = shalt.err (!%p1178_p2)
}
  0x4f   : > { %1072 = dma.hbm_to_vmem [thread:$0]  (!%p1427_p11), %s1424_s25, 128, %s1431_s29, %s178_s13  }
  0x50   : > { %s195_s11 = sand.u32 1, %s1286_s18   ;;  %s199_s14 = scalar_lea.vmem [#allocation5], %s1419_s7 }
  0x51   : > { %s206_s20 = sshll.u32 %s199_s14, 4  ;;  %s196_s26 = scalar_lea.sflag [#allocation6], %s195_s11  ;;  %s207_s20 = int_to_ptr.vmem [resolvable:$true] %s206_s20 }
  0x52   : > { %s1182_s8 = scalar_lea.hbm %s1436_s12, 128  ;;  %s1187_s6 = scalar_lea.hbm %s1591_s1, 256 }
  0x53   : > { %p1183_p5 = scmp.ne.s32.totalorder %s1436_s12, %s1182_s8  ;;  %p1188_p6 = scmp.lt.u32.totalorder %s1436_s12, %s1591_s1 }
  0x54   : > { %p1189_p8 = scmp.lt.u32.totalorder %s1187_s6, %s1182_s8  ;;  %p1191_p13 = scmp.lt.u32.totalorder %s1182_s8, %s1436_s12 }
  0x55   : > { %p1185_p1 = pnand %p1183_p5, %p1154_p0 }
  0x56   : > { %p1190_p10 = por %p1189_p8, %p1188_p6 }
  0x57   : > { %p1186_p4 = pneg %p1185_p1 }
  0x58   : > { %p1192_p3 = por %p1191_p13, %p1190_p10 }
  0x5a   : > { %p1193_p7 = pnand %p1192_p3, %p1186_p4 }
  0x5c   : > { %1196 = shalt.err (!%p1193_p7)
}
  0x5d   : > { %s1197_s7 = scalar_lea.vmem %s207_s20, 128  ;;  %s1292_s25 = smov [#allocation5]  }
  0x5e   : > { %p1198_p9 = scmp.ne.s32.totalorder %s207_s20, %s1197_s7  ;;  %s1202_s29 = sshll.u32 %s1292_s25, 4  ;;  %s1203_s29 = int_to_ptr.vmem [resolvable:$false] %s1202_s29 }
  0x5f   : > { %s1204_s13 = scalar_lea.vmem %s1203_s29, 256  ;;  %p1205_p1 = scmp.lt.s32.totalorder %s207_s20, %s1203_s29 }
  0x60   : > { %p1200_p2 = pnand %p1198_p9, %p1154_p0  ;;  %p1206_p12 = scmp.lt.s32.totalorder %s1204_s13, %s1197_s7 }
  0x62   : > { %p1201_p5 = pneg %p1200_p2  ;;  %p1207_p6 = por %p1206_p12, %p1205_p1 }
  0x64   : > { %p1208_p8 = pnand %p1207_p6, %p1201_p5 }
  0x66   : > { %1211 = shalt.err (!%p1208_p8)
}
  0x67   : > { %1075 = dma.hbm_to_vmem [thread:$0]  (!%p1427_p11), %s1436_s12, 128, %s207_s20, %s196_s26  }
  0x68   : > { %p1608_p4 = scmp.ne.s32.totalorder %s1602_s23, 0 }
  0x69   : > { %s1487_s11 = sand.u32 (!%p1608_p4), 1, %s1278_s16   ;;  %p1609_p12 = scmp.ne.s32.totalorder (!%p1608_p4), %s1600_s21, 0 }
  0x6a   : > { %215 = sbr.rel (%p1608_p4) target bundleno = 699 (0x2bb), region = 36  ;;  %s1490_s14 = sshll.u32 (!%p1608_p4), %s1487_s11, 3 }
  0x6b   : > { %s218_s8 = scalar_lea.sflag (!%p1608_p4), [#allocation3], %s1487_s11  ;;  %s221_s28 = scalar_lea.vmem (!%p1608_p4), [#allocation2], %s1490_s14 }
  0x71   : > { %1257 = dma.done.wait (%p1609_p12), %s218_s8, 128  }
  0x72   : > { %1259 = vsyncadd (%p1609_p12), %s218_s8, 4294967168  ;;  %s226_s23 = sand.u32 1, %s1343_s19   ;;  %s230_s12 = scalar_lea.vmem [#allocation5], %s1490_s14 }
  0x73   : > { %s227_s9 = scalar_lea.sflag [#allocation6], %s226_s23 }
  0x74   : > { %1261 = dma.done.wait (%p1609_p12), %s227_s9, 128  }
  0x75   : > { %1263 = vsyncadd (%p1609_p12), %s227_s9, 4294967168  ;;  %p1610_p11 = scmp.eq.s32.totalorder %s1343_s19, 0 }
  0x77   : > { %1265 = dma.done.wait (%p1610_p11), [#allocation6], 512   ;;  %p1611_p0 = pmov %p1610_p11 }
  0x78   : > { %v1293_v0 = vmov 0.0|0.0   ;;  %vm1294_vm0 = vmmov 0   ;;  %v1295_v1 = vmov 0.0   ;;  %vm274_vm1 = vcmask 261120   ;;  %v265_v2 = vld [vmem:[#allocation7] sm:$0xff]  ;;  %v266_v3 = vld [vmem:[#allocation7 + $0x8] sm:$0xff] }
  0x79   : > { %1267 = vsyncadd (%p1611_p0), [#allocation6], 4294966784  ;;  %1019 = vmatprep.subr.bf16.mxu0 %v1293_v0  ;;  %1025 = vmatprep.subr.bf16.mxu1 %v1293_v0  ;;  %v267_v4 = vld [vmem:[#allocation7 + $0x10] sm:$0xff]  ;;  %v279_v5 = vand.u32 4294901760, %v265_v2  ;;  %v282_v6 = vand.u32 4294901760, %v266_v3  ;;  %v268_v7 = vld [vmem:[#allocation7 + $0x18] sm:$0xff]  ;;  %v270_v41 = vlaneseq }
  0x7a   : > { %961 = vmatprep.mubr.msk.f32.mxu0 %vm1294_vm0, %v1295_v1  ;;  %972 = vmatprep.mubr.msk.f32.mxu1 %vm1294_vm0, %v1295_v1  ;;  %v285_v8 = vand.u32 4294901760, %v267_v4  ;;  %v264_v9 = vld [vmem:[%s221_s28] sm:$0xff]  ;;  %v288_v10 = vand.u32 4294901760, %v268_v7  ;;  %v763_v62 = vld [vmem:[%s230_s12] sm:$0xff]  ;;  %s920_s26 = sshll.u32 %s1343_s19, 7  ;;  %s263_s5 = scalar_lea.vmem [#allocation8], %s1490_s14 }
  0x7b   : > { %v276_v11 = vsel %vm274_vm1, %v264_v9, 0  ;;  %v1020_v12 = vpack.c.bf16 %v282_v6, %v279_v5  ;;  %v359_v13 = vsub.f32 %v265_v2, %v279_v5  ;;  %v366_v14 = vsub.f32 %v266_v3, %v282_v6  ;;  %v269_v44 = vld [vmem:[%s1593_s3] sm:$0x7]  ;;  %s804_s6 = sshll.u32 %s263_s5, 4  ;;  %s1545_s7 = scalar_lea.hbm %s1594_s4, %s920_s26  ;;  %s1547_s6 = int_to_ptr.vmem [resolvable:$true] %s804_s6 }
  0x7c   : > { %v373_v15 = vsub.f32 %v267_v4, %v285_v8  ;;  %v380_v16 = vsub.f32 %v268_v7, %v288_v10  ;;  %v347_v17 = vand.u32 4294901760, %v276_v11  ;;  %v1023_v18 = vpack.c.bf16 %v288_v10, %v285_v8  ;;  %s791_s25 = scalar_lea.sflag [#allocation4], %s1487_s11  ;;  %s1212_s29 = scalar_lea.vmem %s1547_s6, 128 }
  0x7d   : > { %1021 = vmatpush3.bf16.msra.mxu0 %v1020_v12  ;;  %v360_v19 = vand.u32 4294901760, %v359_v13  ;;  %v367_v20 = vand.u32 4294901760, %v366_v14  ;;  %v1032_v35 = vpack.c.bf16 %v366_v14, %v359_v13  ;;  %v271_v42 = vshrl.u32 %v270_v41, 7  ;;  %p1213_p10 = scmp.ne.s32.totalorder %s1547_s6, %s1212_s29  ;;  %p1612_p13 = scmp.ne.s32.totalorder %s1606_s30, 0 }
  0x7e   : > { %v374_v21 = vand.u32 4294901760, %v373_v15  ;;  %1022 = vmatprep.subr.bf16.mxu0 %v1293_v0  ;;  %v348_v22 = vsub.f32 %v276_v11, %v347_v17  ;;  %v381_v23 = vand.u32 4294901760, %v380_v16  ;;  %v1035_v38 = vpack.c.bf16 %v380_v16, %v373_v15  ;;  %s1296_s19 = smov [#allocation8]  }
  0x7f   : > { %v361_v24 = vsub.f32 %v359_v13, %v360_v19  ;;  %v368_v25 = vsub.f32 %v366_v14, %v367_v20  ;;  %v1044_v39 = vpack.c.bf16 %v367_v20, %v360_v19  ;;  %v272_v43 = vsub.s32 0, %v271_v42  ;;  %p1214_p3 = pnand %p1213_p10, %p1612_p13  ;;  %s1216_s13 = sshll.u32 %s1296_s19, 4  ;;  %s1217_s13 = int_to_ptr.vmem [resolvable:$false] %s1216_s13 }
  0x80   : > { %v375_v26 = vsub.f32 %v373_v15, %v374_v21  ;;  %v349_v27 = vand.u32 4294901760, %v348_v22  ;;  %v382_v28 = vsub.f32 %v380_v16, %v381_v23  ;;  %v1047_v40 = vpack.c.bf16 %v381_v23, %v374_v21  ;;  %s1218_s14 = scalar_lea.vmem %s1217_s13, 256  ;;  %p1219_p9 = scmp.lt.s32.totalorder %s1547_s6, %s1217_s13 }
  0x81   : > { %1024 = vmatpush3.bf16.msra.mxu0 %v1023_v18  ;;  %v362_v29 = vand.u32 4294901760, %v361_v24  ;;  %v369_v30 = vand.u32 4294901760, %v368_v25  ;;  %v273_v45 = vrot.slane %v269_v44, %v272_v43  ;;  %v780_v11 = vsub.s32 1, %v271_v42  ;;  %p1215_p7 = pneg %p1214_p3  ;;  %p1220_p2 = scmp.lt.s32.totalorder %s1218_s14, %s1212_s29 }
  0x82   : > { %v376_v31 = vand.u32 4294901760, %v375_v26  ;;  %1031 = vmatprep.subr.bf16.mxu0 %v1293_v0  ;;  %v350_v32 = vsub.f32 %v348_v22, %v349_v27  ;;  %v383_v33 = vand.u32 4294901760, %v382_v28  ;;  %v786_v13 = vsub.s32 2, %v271_v42 }
  0x83   : > { %v1026_v34 = vpack.c.bf16 %v369_v30, %v362_v29  ;;  %p1221_p5 = por %p1220_p2, %p1219_p9 }
  0x84   : > { %v351_v36 = vand.u32 4294901760, %v350_v32  ;;  %v1029_v37 = vpack.c.bf16 %v383_v33, %v376_v31  ;;  %v787_v15 = vrot.slane %v269_v44, %v786_v13 }
  0x85   : > { %1027 = vmatpush3.bf16.msra.mxu1 %v1026_v34  ;;  %p1222_p1 = pnand %p1221_p5, %p1215_p7 }
  0x86   : > { %962 = vmatmul.mubr.f32.vlgmr.msra.gmra.mrb[0].mxu0 %v351_v36  ;;  %1028 = vmatprep.subr.bf16.mxu1 %v1293_v0 }
  0x87   : > { %1033 = vmatpush3.bf16.msra.mxu0 %v1032_v35  ;;  %983 = vmatprep.mubr.msk.f32.mxu0 %vm1294_vm0, %v1295_v1 }
  0x88   : > { %1034 = vmatprep.subr.bf16.mxu0 %v1293_v0 }
  0x89   : > { %1030 = vmatpush3.bf16.msra.mxu1 %v1029_v37 }
  0x8a   : > { %1037 = vmatprep.subr.bf16.mxu1 %v1293_v0 }
  0x8b   : > { %1036 = vmatpush3.bf16.msra.mxu0 %v1035_v38 }
  0x8c   : > { %973 = vmatmul.mubr.f32.vlgmr.msra.gmra.mrb[0].mxu1 %v347_v17  ;;  %1043 = vmatprep.subr.bf16.mxu0 %v1293_v0 }
  0x8d   : > { %1039 = vmatpush3.bf16.msra.mxu1 %v1020_v12  ;;  %994 = vmatprep.mubr.msk.f32.mxu1 %vm1294_vm0, %v1295_v1 }
  0x8e   : > { %984 = vmatmul.mubr.f32.vlgmr.msra.gmra.mrb[2].mxu0 %v348_v22  ;;  %1040 = vmatprep.subr.bf16.mxu1 %v1293_v0 }
  0x8f   : > { %1045 = vmatpush3.bf16.msra.mxu0 %v1044_v39  ;;  %1005 = vmatprep.mubr.msk.f32.mxu0 %vm1294_vm0, %v1295_v1 }
  0x90   : > { %1046 = vmatprep.subr.bf16.mxu0 %v1293_v0 }
  0x91   : > { %1042 = vmatpush3.bf16.msra.mxu1 %v1023_v18 }
  0x92   : > { %1049 = vmatprep.subr.bf16.mxu1 %v1293_v0 }
  0x93   : > { %1048 = vmatpush3.bf16.msra.mxu0 %v1047_v40 }
  0x94   : > { %995 = vmatmul.mubr.f32.vlgmr.msra.gmra.mrb[2].mxu1 %v349_v27 }
  0x95   : > { %1051 = vmatpush3.bf16.msra.mxu1 %v1020_v12  ;;  %1016 = vmatprep.mubr.msk.f32.mxu1 %vm1294_vm0, %v1295_v1  ;;  %v781_v12 = vrot.slane %v269_v44, %v780_v11 }
  0x96   : > { %1006 = vmatmul.mubr.f32.vlgmr.msra.gmra.mrb[4].mxu0 %v347_v17  ;;  %1052 = vmatprep.subr.bf16.mxu1 %v1293_v0 }
  0x99   : > { %1054 = vmatpush3.bf16.msra.mxu1 %v1023_v18 }
  0x9c   : > { %1017 = vmatmul.mubr.f32.vlgmr.msra.gmra.mrb[4].mxu1 %v347_v17 }
 0x159   : > { %v353_v46 = vpop.f32.mrb[0].mxu0 }
 0x15a   : > { %v963_v47 = vpop.f32.mrb[1].mxu0  ;;  %v354_v48 = vadd.f32 %v353_v46, %v273_v45 }
 0x15f   : > { %v444_v49 = vpop.f32.mrb[0].mxu1 }
 0x160   : > { %v445_v50 = vadd.f32 %v444_v49, %v354_v48  ;;  %v974_v51 = vpop.f32.mrb[1].mxu1 }
 0x161   : > { %v524_v52 = vpop.f32.mrb[2].mxu0 }
 0x162   : > { %v525_v53 = vadd.f32 %v524_v52, %v445_v50  ;;  %v985_v54 = vpop.f32.mrb[3].mxu0 }
 0x167   : > { %v601_v55 = vpop.f32.mrb[2].mxu1 }
 0x168   : > { %v602_v56 = vadd.f32 %v601_v55, %v525_v53  ;;  %v996_v57 = vpop.f32.mrb[3].mxu1 }
 0x169   : > { %v684_v58 = vpop.f32.mrb[4].mxu0 }
 0x16a   : > { %v685_v59 = vadd.f32 %v684_v58, %v602_v56  ;;  %v1007_v60 = vpop.f32.mrb[5].mxu0 }
 0x16f   : > { %v759_v61 = vpop.f32.mrb[4].mxu1 }
 0x170   : > { %v760_v63 = vadd.f32 %v759_v61, %v685_v59  ;;  %v1018_v0 = vpop.f32.mrb[5].mxu1 }
 0x172   : > { %v764_v1 = vadd.f32 %v763_v62, %v760_v63 }
 0x174   : > { %v765_v2 = vsel %vm274_vm1, %v764_v1, 0.0 }
 0x175   : > { %766 = vadd.xlane.f32.xlu0 %v765_v2 }
 0x202   : > { %v767_v3 = vpop.xlane.xlu0 %766 }
 0x203   : > { %v769_v4 = vmul.f32 0.03125, %v767_v3 }
 0x205   : > { %v770_v5 = vsub.f32 %v764_v1, %v769_v4 }
 0x207   : > { %v771_v6 = vmul.f32 %v770_v5, %v770_v5 }
 0x209   : > { %v772_v7 = vsel %vm274_vm1, %v771_v6, 0.0 }
 0x20a   : > { %773 = vadd.xlane.f32.xlu0 %v772_v7 }
 0x297   : > { %v774_v8 = vpop.xlane.xlu0 %773 }
 0x298   : > { %v775_v9 = vmul.f32 0.03125, %v774_v8 }
 0x29a   : > { %v776_v10 = vadd.f32 1e-12, %v775_v9 }
 0x29c   : > { %1122 = vrsqrt.f32 %v776_v10 }
 0x2a6   : > { %v1123_v14 = vpop.eup %1122 }
 0x2a7   : > { %v782_v16 = vmul.f32 %v1123_v14, %v781_v12 }
 0x2a9   : > { %v783_v17 = vmul.f32 %v782_v16, %v770_v5 }
 0x2ab   : > { %v788_v18 = vadd.f32 %v787_v15, %v783_v17 }
 0x2ad   : > { %789 = vst.msk [vmem:[%s263_s5] sm:$0xff] %vm274_vm1, %v788_v18 }
 0x2ae   : > { %1225 = shalt.err (!%p1222_p1)
}
 0x2af   : > { %s1226_s11 = scalar_lea.hbm %s1545_s7, 128  ;;  %s1230_s23 = scalar_lea.hbm %s1594_s4, 256 }
 0x2b0   : > { %p1227_p6 = scmp.ne.s32.totalorder %s1545_s7, %s1226_s11  ;;  %p1231_p12 = scmp.lt.u32.totalorder %s1545_s7, %s1594_s4 }
 0x2b1   : > { %p1232_p11 = scmp.lt.u32.totalorder %s1230_s23, %s1226_s11  ;;  %p1234_p10 = scmp.lt.u32.totalorder %s1226_s11, %s1545_s7 }
 0x2b2   : > { %p1228_p8 = pnand %p1227_p6, %p1612_p13 }
 0x2b3   : > { %p1233_p0 = por %p1232_p11, %p1231_p12 }
 0x2b4   : > { %p1229_p4 = pneg %p1228_p8 }
 0x2b5   : > { %p1235_p3 = por %p1234_p10, %p1233_p0 }
 0x2b7   : > { %p1236_p7 = pnand %p1235_p3, %p1229_p4 }
 0x2b9   : > { %1239 = shalt.err (!%p1236_p7)
}
 0x2ba   : > { %1063 = dma.vmem_to_hbm [thread:$0]  (%p1612_p13), %s1547_s6, 128, %s1545_s7, %s791_s25  }
 0x2bb PF: > { %s816_s21 = sand.u32 1, %s1274_s15   ;;  %p1613_p9 = scmp.ne.s32.totalorder %s1601_s22, 0 }
 0x2bc   : > { %p1614_p2 = scmp.ge.s32.totalorder %s1286_s18, 2  ;;  %s817_s20 = scalar_lea.sflag [#allocation4], %s816_s21 }
 0x2be   : > { %p1077_p5 = pnand %p1614_p2, %p1613_p9 }
 0x2c0   : > { %1269 = dma.done.wait (!%p1077_p5), %s817_s20, 128  }
 0x2c1   : > { %1271 = vsyncadd (!%p1077_p5), %s817_s20, 4294967168  ;;  %p20_p1 = scmp.ge.s32.totalorder %s1378_s27, 4   ;;  %s1615_s15 = smov %s1278_s16 }
 0x2c2   : > { %s1616_s16 = smov %s1282_s17  ;;  %s1617_s17 = smov %s1409_s24 }
 0x2c3   : > { %s1618_s18 = smov %s1378_s27  ;;  %22 = sbr.rel (!%p20_p1) target bundleno = 9 (0x9), region = 98 }
 0x2ca   :  { %822 = vsyncpa [#allocation3], 1 }
 0x2cb   :  { %824 = vsyncpa [#allocation3 + $0x1], 1 }
 0x2cc   :  { %825 = vsyncpa [#allocation6], 1 }
 0x2cd   :  { %827 = vsyncpa [#allocation6 + $0x1], 1 }
 0x2ce   :  { %828 = vsyncpa [#allocation4], 1 }
 0x2cf   :  { %830 = vsyncpa [#allocation4 + $0x1], 1 }

</bundles_post_ra>
